<compile_context>
chip_gen: v7x
topology: tpu7x:2x2x1
jax: 0.10.0
libtpu: 0.0.40
codegen_flags: <defaults>
</compile_context>

<pallas_src>
import jax
import jax.numpy as jnp
from jax.experimental import pallas as pl
from jax.experimental.pallas import tpu as pltpu


def _round_up(x: int, m: int) -> int:
    return ((x + m - 1) // m) * m


def frc_classifier_kernel(x_ref, w1_ref, b1_ref, w2_ref, b2_ref, out_ref):
    # x_ref:  (TM, K_pad)     bf16  -- K = C*R*R, avg-pool folded into W1
    # w1_ref: (K_pad, H_pad)  bf16  -- resident across grid
    # b1_ref: (1, H_pad)      f32
    # w2_ref: (H_pad, L_pad)  bf16  -- resident across grid
    # b2_ref: (1, L_pad)      f32
    # out_ref:(TM, L_pad)     f32
    h = jnp.dot(x_ref[...], w1_ref[...],
                preferred_element_type=jnp.float32)         # AvgPool+Flatten+Linear1
    h = jnp.maximum(h + b1_ref[...], 0.0)                   # bias + ReLU (Dropout=identity)
    s = jnp.dot(h.astype(w2_ref.dtype), w2_ref[...],
                preferred_element_type=jnp.float32)         # Linear2
    out_ref[...] = (s + b2_ref[...]).astype(out_ref.dtype)


def frc_classifier_forward(rois_nchw, w1, b1, w2, b2):
    """rois_nchw: (N, C, R, R) f32.  w1: (C, H), b1: (H,), w2: (H, L), b2: (L,).

    Returns (N, L) f32 scores matching the PyTorch module in eval mode
    (bf16-level tolerance due to bf16 MXU operands).
    """
    N, C, R, R2 = rois_nchw.shape
    assert R == R2, "roi must be square (roi_size x roi_size)"
    H = w1.shape[1]
    L = w2.shape[1]
    HW = R * R
    K = C * HW
    K_pad = _round_up(K, 128)
    H_pad = _round_up(H, 128)
    L_pad = _round_up(L, 128)

    # ---- host-side layout / dtype prep (one-time glue) ----------------------
    x = rois_nchw.reshape(N, K).astype(jnp.bfloat16)                     # lane-dense rows
    w1x = (jnp.repeat(w1, HW, axis=0) / float(HW)).astype(jnp.bfloat16)  # fold avg-pool
    if K_pad != K:                                                       # lane-align K
        x = jnp.pad(x, ((0, 0), (0, K_pad - K)))
        w1x = jnp.pad(w1x, ((0, K_pad - K), (0, 0)))
    if H_pad != H:                                                       # lane-align H
        w1x = jnp.pad(w1x, ((0, 0), (0, H_pad - H)))
    b1p = jnp.zeros((1, H_pad), jnp.float32).at[:, :H].set(b1.astype(jnp.float32))
    w2p = jnp.zeros((H_pad, L_pad), jnp.bfloat16).at[:H, :L].set(w2.astype(jnp.bfloat16))
    b2p = jnp.zeros((1, L_pad), jnp.float32).at[:, :L].set(b2.astype(jnp.float32))

    # ---- tiling over the ROI/batch axis --------------------------------------
    TM = min(512, _round_up(N, 8))      # big tiles amortize per-step overhead; tiny N stays tiny
    N_pad = _round_up(N, TM)
    if N_pad != N:
        x = jnp.pad(x, ((0, N_pad - N), (0, 0)))
    grid = (N_pad // TM,)

    # Explicit VMEM budget: double-buffered streaming tiles + resident weights.
    vmem_bytes = (2 * TM * K_pad * 2          # rois tile (bf16, double-buffered)
                  + K_pad * H_pad * 2         # W1 (bf16, resident)
                  + H_pad * L_pad * 2         # W2 (bf16, resident)
                  + 2 * TM * L_pad * 4        # output tile (f32, double-buffered)
                  + 2 * 8 * H_pad * 4         # b1 (padded sublane tile)
                  + 2 * 8 * L_pad * 4)        # b2 (padded sublane tile)
    vmem_limit = int(min(max(2 * vmem_bytes, 16 * 1024 * 1024), 64 * 1024 * 1024))

    cost = pl.CostEstimate(
        flops=2 * N_pad * (K_pad * H_pad + H_pad * L_pad),
        transcendentals=0,
        bytes_accessed=(N_pad * K_pad * 2 + K_pad * H_pad * 2 + H_pad * L_pad * 2
                        + H_pad * 4 + L_pad * 4 + N_pad * L_pad * 4),
    )

    out = pl.pallas_call(
        frc_classifier_kernel,
        out_shape=jax.ShapeDtypeStruct((N_pad, L_pad), jnp.float32),
        grid_spec=pltpu.PrefetchScalarGridSpec(
            num_scalar_prefetch=0,
            grid=grid,
            in_specs=[
                pl.BlockSpec((TM, K_pad), lambda i: (i, 0)),      # streamed rois tile
                pl.BlockSpec((K_pad, H_pad), lambda i: (0, 0)),   # resident W1
                pl.BlockSpec((1, H_pad), lambda i: (0, 0)),       # resident b1
                pl.BlockSpec((H_pad, L_pad), lambda i: (0, 0)),   # resident W2
                pl.BlockSpec((1, L_pad), lambda i: (0, 0)),       # resident b2
            ],
            out_specs=pl.BlockSpec((TM, L_pad), lambda i: (i, 0)),
        ),
        compiler_params=pltpu.CompilerParams(
            dimension_semantics=("parallel",),
            vmem_limit_bytes=vmem_limit,
        ),
        cost_estimate=cost,
    )(x, w1x, b1p, w2p, b2p)

    return out[:N, :L]


def reference_forward(rois_nchw, w1, b1, w2, b2):
    # Pure-JAX f32 reference mirroring the PyTorch module (eval mode).
    pooled = jnp.mean(rois_nchw, axis=(2, 3))           # AvgPool2d(roi_size) + Flatten
    h = jnp.maximum(pooled @ w1 + b1, 0.0)              # Linear1 + Dropout(eval) + ReLU
    return h @ w2 + b2                                  # Linear2


if __name__ == "__main__":
    # Small deterministic configuration consistent with the module's forward:
    #   roi_size=4, backbone_size=(32,), hidden_dim=128, n_labels=8, batch N=8
    N, C, R = 8, 32, 4
    hidden_dim, n_labels = 128, 8

    key = jax.random.PRNGKey(0)
    k_rois, k_w1, k_b1, k_w2, k_b2 = jax.random.split(key, 5)

    rois = jax.random.normal(k_rois, (N, C, R, R), dtype=jnp.float32)
    # Deterministic parameter init (shapes from __init__); stored as (in, out).
    w1 = jax.random.normal(k_w1, (C, hidden_dim), dtype=jnp.float32) * 0.1
    b1 = jax.random.normal(k_b1, (hidden_dim,), dtype=jnp.float32) * 0.1
    w2 = jax.random.normal(k_w2, (hidden_dim, n_labels), dtype=jnp.float32) * 0.1
    b2 = jax.random.normal(k_b2, (n_labels,), dtype=jnp.float32) * 0.1

    scores = frc_classifier_forward(rois, w1, b1, w2, b2)
    jax.block_until_ready(scores)

    ref = reference_forward(rois, w1, b1, w2, b2)
    assert scores.shape == (N, n_labels)
    assert jnp.allclose(scores, ref, atol=2e-2, rtol=2e-2), "mismatch vs reference"

    print("KERNEL_OK")
</pallas_src>

<mosaic_0001>
module attributes {stable_mosaic.version = 11 : i64} {
  func.func @frc_classifier_kernel(%arg0: i32, %arg1: memref<8x512xbf16, #tpu.memory_space<vmem>>, %arg2: memref<512x128xbf16, #tpu.memory_space<vmem>>, %arg3: memref<1x128xf32, #tpu.memory_space<vmem>>, %arg4: memref<128x128xbf16, #tpu.memory_space<vmem>>, %arg5: memref<1x128xf32, #tpu.memory_space<vmem>>, %arg6: memref<8x128xf32, #tpu.memory_space<vmem>>) attributes {dimension_semantics = [#tpu.dimension_semantics<parallel>], iteration_bounds = array<i64: 1>, scalar_prefetch = 0 : i64, scratch_operands = 0 : i64, tpu.core_type = #tpu.core_type<tc>, window_params = [{transform_indices = @transform_0, window_bounds = array<i64: 8, 512>}, {pipeline_mode = #tpu.pipeline_mode<synchronous>, transform_indices = @transform_1, window_bounds = array<i64: 512, 128>}, {pipeline_mode = #tpu.pipeline_mode<synchronous>, transform_indices = @transform_2, window_bounds = array<i64: 1, 128>}, {pipeline_mode = #tpu.pipeline_mode<synchronous>, transform_indices = @transform_3, window_bounds = array<i64: 128, 128>}, {pipeline_mode = #tpu.pipeline_mode<synchronous>, transform_indices = @transform_4, window_bounds = array<i64: 1, 128>}, {transform_indices = @transform_5, window_bounds = array<i64: 8, 128>}]} {
    %c0 = arith.constant 0 : index
    %c0_0 = arith.constant 0 : index
    %0 = vector.load %arg1[%c0, %c0_0] : memref<8x512xbf16, #tpu.memory_space<vmem>>, vector<8x512xbf16>
    %c0_1 = arith.constant 0 : index
    %c0_2 = arith.constant 0 : index
    %1 = vector.load %arg2[%c0_1, %c0_2] : memref<512x128xbf16, #tpu.memory_space<vmem>>, vector<512x128xbf16>
    %cst = arith.constant dense<0.000000e+00> : vector<8x128xf32>
    %2 = tpu.matmul %0, %1, %cst {dimension_numbers = #tpu.dot_dimension_numbers<[1], [0], [0], [1], [0, 0, 1, 1], [], []>} : vector<8x512xbf16>, vector<512x128xbf16>, vector<8x128xf32> -> vector<8x128xf32>
    %c0_3 = arith.constant 0 : index
    %c0_4 = arith.constant 0 : index
    %3 = vector.load %arg3[%c0_3, %c0_4] : memref<1x128xf32, #tpu.memory_space<vmem>>, vector<1x128xf32>
    %4 = vector.broadcast %3 : vector<1x128xf32> to vector<8x128xf32>
    %5 = arith.addf %2, %4 : vector<8x128xf32>
    %cst_5 = arith.constant 0.000000e+00 : f32
    %6 = vector.broadcast %cst_5 : f32 to vector<8x128xf32>
    %7 = arith.maximumf %5, %6 : vector<8x128xf32>
    %8 = arith.truncf %7 : vector<8x128xf32> to vector<8x128xbf16>
    %c0_6 = arith.constant 0 : index
    %c0_7 = arith.constant 0 : index
    %9 = vector.load %arg4[%c0_6, %c0_7] : memref<128x128xbf16, #tpu.memory_space<vmem>>, vector<128x128xbf16>
    %cst_8 = arith.constant dense<0.000000e+00> : vector<8x128xf32>
    %10 = tpu.matmul %8, %9, %cst_8 {dimension_numbers = #tpu.dot_dimension_numbers<[1], [0], [0], [1], [0, 0, 1, 1], [], []>} : vector<8x128xbf16>, vector<128x128xbf16>, vector<8x128xf32> -> vector<8x128xf32>
    %c0_9 = arith.constant 0 : index
    %c0_10 = arith.constant 0 : index
    %11 = vector.load %arg5[%c0_9, %c0_10] : memref<1x128xf32, #tpu.memory_space<vmem>>, vector<1x128xf32>
    %12 = vector.broadcast %11 : vector<1x128xf32> to vector<8x128xf32>
    %13 = arith.addf %10, %12 : vector<8x128xf32>
    %c0_11 = arith.constant 0 : index
    %c0_12 = arith.constant 0 : index
    %14 = vector.load %arg6[%c0_11, %c0_12] : memref<8x128xf32, #tpu.memory_space<vmem>>, vector<8x128xf32>
    tpu.vector_store %arg6[%c0_11, %c0_12], %13 {strides = array<i32>} : memref<8x128xf32, #tpu.memory_space<vmem>>, vector<8x128xf32>,
    return
  }
  func.func @transform_0(%arg0: i32) -> (i32, i32) {
    %c0_i32 = arith.constant 0 : i32
    %c0_i32_0 = arith.constant 0 : i32
    return %arg0, %c0_i32 : i32, i32
  }
  func.func @transform_1(%arg0: i32) -> (i32, i32) {
    %c0_i32 = arith.constant 0 : i32
    %c0_i32_0 = arith.constant 0 : i32
    %c0_i32_1 = arith.constant 0 : i32
    return %c0_i32, %c0_i32_0 : i32, i32
  }
  func.func @transform_2(%arg0: i32) -> (i32, i32) {
    %c0_i32 = arith.constant 0 : i32
    %c0_i32_0 = arith.constant 0 : i32
    %c0_i32_1 = arith.constant 0 : i32
    return %c0_i32, %c0_i32_0 : i32, i32
  }
  func.func @transform_3(%arg0: i32) -> (i32, i32) {
    %c0_i32 = arith.constant 0 : i32
    %c0_i32_0 = arith.constant 0 : i32
    %c0_i32_1 = arith.constant 0 : i32
    return %c0_i32, %c0_i32_0 : i32, i32
  }
  func.func @transform_4(%arg0: i32) -> (i32, i32) {
    %c0_i32 = arith.constant 0 : i32
    %c0_i32_0 = arith.constant 0 : i32
    %c0_i32_1 = arith.constant 0 : i32
    return %c0_i32, %c0_i32_0 : i32, i32
  }
  func.func @transform_5(%arg0: i32) -> (i32, i32) {
    %c0_i32 = arith.constant 0 : i32
    %c0_i32_0 = arith.constant 0 : i32
    return %arg0, %c0_i32 : i32, i32
  }
}

</mosaic_0001>

<bundles_post_ra>
// kernel: tpu_custom_call.1
= control target key start
LH: loop header
LB: loop body
LE: loop exit
PB: predicated region body
PF: predicated region fallthrough
CT: control target
= control target key end

     0   :  { %10 = vsyncpa [#allocation3], 0  ;;  %s913_s0 = inlined_call_operand.hbm [shape: bf16[8,512], index: 0, kind: input, shape index: {}]   ;;  %s914_s1 = inlined_call_operand.hbm [shape: bf16[512,128], index: 1, kind: input, shape index: {}]   ;;  %s915_s2 = inlined_call_operand.vmem [shape: f32[1,128], index: 2, kind: input, shape index: {}]   ;;  %s916_s3 = inlined_call_operand.hbm [shape: bf16[128,128], index: 3, kind: input, shape index: {}]   ;;  %s917_s4 = inlined_call_operand.vmem [shape: f32[1,128], index: 4, kind: input, shape index: {}]   ;;  %s918_s5 = inlined_call_operand.hbm [shape: f32[8,128], index: 5, kind: output, shape index: {}]  }
   0x1   :  { %11 = vsyncpa [#allocation6], 0 }
   0x2   :  { %12 = vsyncpa [#allocation4], 0  ;;  %s815_s18 = smov [#allocation5]   ;;  %s721_s22 = scalar_lea.hbm %s914_s1, 4096 }
   0x3   :  { %s28_s19 = sshll.u32 %s815_s18, 4  ;;  %p722_p0 = scmp.ne.s32.totalorder %s914_s1, %s721_s22  ;;  %s29_s19 = int_to_ptr.vmem [resolvable:$true] %s28_s19 }
   0x4   :  { %p725_p1 = scmp.lt.u32.totalorder %s721_s22, %s914_s1 }
   0x6   :  { %p727_p2 = pnand %p725_p1, %p722_p0 }
   0x8   :  { %730 = shalt.err (!%p727_p2)
}
   0x9   :  { %s731_s27 = scalar_lea.vmem %s29_s19, 4096  ;;  %p736_p4 = scmp.lt.s32.totalorder %s29_s19, %s29_s19 }
   0xa   :  { %p732_p3 = scmp.ne.s32.totalorder %s29_s19, %s731_s27  ;;  %p737_p5 = scmp.lt.s32.totalorder %s731_s27, %s731_s27 }
   0xc   :  { %p738_p6 = por %p737_p5, %p736_p4 }
   0xe   :  { %p739_p7 = pnand %p738_p6, %p732_p3 }
  0x10   :  { %742 = shalt.err (!%p739_p7)
}
  0x11   :  { %s816_s28 = smov 64   ;;  %s817_s29 = smov 4  }
  0x12   :  { %34 = dma.hbm_to_vmem [thread:$0]  %s914_s1, 4096, %s29_s19, [#allocation6], %s816_s28, %s816_s28, %s817_s29  }
  0x13   :  { %s818_s7 = smov [#allocation2]   ;;  %s819_s9 = smov [#allocation7]  }
  0x14   :  { %s19_s8 = sshll.u32 %s818_s7, 4  ;;  %s42_s10 = sshll.u32 %s819_s9, 4  ;;  %s20_s8 = int_to_ptr.vmem [resolvable:$true] %s19_s8  ;;  %s43_s10 = int_to_ptr.vmem [resolvable:$true] %s42_s10 }
  0x15   :  { %s743_s13 = scalar_lea.hbm %s913_s0, 256 }
  0x16   :  { %p744_p8 = scmp.ne.s32.totalorder %s913_s0, %s743_s13  ;;  %p747_p9 = scmp.lt.u32.totalorder %s743_s13, %s913_s0 }
  0x18   :  { %p749_p10 = pnand %p747_p9, %p744_p8 }
  0x1a   :  { %752 = shalt.err (!%p749_p10)
}
  0x1b   :  { %s753_s1 = scalar_lea.vmem %s20_s8, 256  ;;  %p758_p12 = scmp.lt.s32.totalorder %s20_s8, %s20_s8 }
  0x1c   :  { %p754_p11 = scmp.ne.s32.totalorder %s20_s8, %s753_s1  ;;  %p759_p13 = scmp.lt.s32.totalorder %s753_s1, %s753_s1 }
  0x1e   :  { %p760_p0 = por %p759_p13, %p758_p12 }
  0x20   :  { %p761_p1 = pnand %p760_p0, %p754_p11 }
  0x22   :  { %764 = shalt.err (!%p761_p1)
}
  0x23   :  { %22 = dma.hbm_to_vmem [thread:$0]  %s913_s0, 256, %s20_s8, [#allocation3]  }
  0x24   :  { %s765_s22 = scalar_lea.hbm %s916_s3, 1024 }
  0x25   :  { %p766_p2 = scmp.ne.s32.totalorder %s916_s3, %s765_s22  ;;  %p769_p3 = scmp.lt.u32.totalorder %s765_s22, %s916_s3 }
  0x27   :  { %p771_p4 = pnand %p769_p3, %p766_p2 }
  0x29   :  { %774 = shalt.err (!%p771_p4)
}
  0x2a   :  { %s775_s27 = scalar_lea.vmem %s43_s10, 1024  ;;  %p780_p6 = scmp.lt.s32.totalorder %s43_s10, %s43_s10 }
  0x2b   :  { %p776_p5 = scmp.ne.s32.totalorder %s43_s10, %s775_s27  ;;  %p781_p7 = scmp.lt.s32.totalorder %s775_s27, %s775_s27 }
  0x2d   :  { %p782_p8 = por %p781_p7, %p780_p6 }
  0x2f   :  { %p783_p9 = pnand %p782_p8, %p776_p5 }
  0x31   :  { %786 = shalt.err (!%p783_p9)
}
  0x32   :  { %48 = dma.hbm_to_vmem [thread:$0]  %s916_s3, 1024, %s43_s10, [#allocation6], %s816_s28, %s816_s28, %s817_s29  }
  0x33   :  { %809 = dma.done.wait [#allocation3], 256  }
  0x34   :  { %810 = vsyncadd [#allocation3], 4294967040 }
  0x35   :  { %811 = dma.done.wait [#allocation6], 5120  }
  0x36   :  { %812 = vsyncadd [#allocation6], 4294962176  ;;  %v677_v0 = vld [vmem:[#allocation5 + $0x40] sm:$0xff]   ;;  %v681_v4 = vld [vmem:[#allocation5 + $0x48] sm:$0xff]   ;;  %v820_v39 = vmov 0.0   ;;  %vm821_vm0 = vmmov 0  }
  0x37   :  { %v678_v1 = vld [vmem:[#allocation5 + $0xc0] sm:$0xff]   ;;  %596 = vmatprep.subr.bf16.mxu0 %v677_v0  ;;  %v682_v5 = vld [vmem:[#allocation5 + $0xc8] sm:$0xff]   ;;  %v685_v8 = vld [vmem:[#allocation5 + $0x50] sm:$0xff]   ;;  %s822_s7 = smov [#allocation8]  }
  0x38   :  { %v679_v2 = vld [vmem:[#allocation5] sm:$0xff]   ;;  %618 = vmatprep.subr.bf16.mxu1 %v678_v1  ;;  %v683_v6 = vld [vmem:[#allocation5 + $0x8] sm:$0xff]   ;;  %v686_v9 = vld [vmem:[#allocation5 + $0xd0] sm:$0xff]   ;;  %s540_s8 = sshll.u32 %s822_s7, 4  ;;  %s541_s8 = int_to_ptr.vmem [resolvable:$true] %s540_s8 }
  0x39   :  { %v680_v3 = vld [vmem:[#allocation5 + $0x80] sm:$0xff]   ;;  %597 = vmatpush3.bf16.msra.mxu0 %v679_v2  ;;  %v684_v7 = vld [vmem:[#allocation5 + $0x88] sm:$0xff]   ;;  %v687_v10 = vld [vmem:[#allocation5 + $0x10] sm:$0xff]   ;;  %p792_p11 = scmp.lt.s32.totalorder %s541_s8, %s541_s8 }
  0x3a   :  { %619 = vmatpush3.bf16.msra.mxu1 %v680_v3  ;;  %598 = vmatprep.subr.bf16.mxu0 %v681_v4  ;;  %v688_v11 = vld [vmem:[#allocation5 + $0x90] sm:$0xff]   ;;  %v689_v12 = vld [vmem:[#allocation5 + $0x58] sm:$0xff]   ;;  %v693_v16 = vld [vmem:[#allocation5 + $0x60] sm:$0xff]  }
  0x3b   :  { %620 = vmatprep.subr.bf16.mxu1 %v682_v5  ;;  %v690_v13 = vld [vmem:[#allocation5 + $0xd8] sm:$0xff]   ;;  %v694_v17 = vld [vmem:[#allocation5 + $0xe0] sm:$0xff]   ;;  %v697_v20 = vld [vmem:[#allocation5 + $0x68] sm:$0xff]  }
  0x3c   :  { %v691_v14 = vld [vmem:[#allocation5 + $0x18] sm:$0xff]   ;;  %v695_v18 = vld [vmem:[#allocation5 + $0x20] sm:$0xff]   ;;  %v698_v21 = vld [vmem:[#allocation5 + $0xe8] sm:$0xff]  }
  0x3d   :  { %599 = vmatpush3.bf16.msra.mxu0 %v683_v6  ;;  %v692_v15 = vld [vmem:[#allocation5 + $0x98] sm:$0xff]   ;;  %v696_v19 = vld [vmem:[#allocation5 + $0xa0] sm:$0xff]   ;;  %v699_v22 = vld [vmem:[#allocation5 + $0x28] sm:$0xff]  }
  0x3e   :  { %621 = vmatpush3.bf16.msra.mxu1 %v684_v7  ;;  %600 = vmatprep.subr.bf16.mxu0 %v685_v8  ;;  %v700_v23 = vld [vmem:[#allocation5 + $0xa8] sm:$0xff]   ;;  %v701_v24 = vld [vmem:[#allocation5 + $0x70] sm:$0xff]   ;;  %v705_v28 = vld [vmem:[#allocation5 + $0x78] sm:$0xff]  }
  0x3f   :  { %622 = vmatprep.subr.bf16.mxu1 %v686_v9  ;;  %v702_v25 = vld [vmem:[#allocation5 + $0xf0] sm:$0xff]   ;;  %v706_v29 = vld [vmem:[#allocation5 + $0xf8] sm:$0xff]   ;;  %v713_v38 = vld [vmem:[#allocation7] sm:$0xff]  }
  0x40   :  { %v703_v26 = vld [vmem:[#allocation5 + $0x30] sm:$0xff]   ;;  %v707_v30 = vld [vmem:[#allocation5 + $0x38] sm:$0xff]   ;;  %v714_v40 = vld [vmem:[#allocation7 + $0x8] sm:$0xff]  }
  0x41   :  { %601 = vmatpush3.bf16.msra.mxu0 %v687_v10  ;;  %v704_v27 = vld [vmem:[#allocation5 + $0xb0] sm:$0xff]   ;;  %v708_v31 = vld [vmem:[#allocation5 + $0xb8] sm:$0xff]   ;;  %v717_v43 = vld [vmem:[#allocation7 + $0x20] sm:$0xff]  }
  0x42   :  { %623 = vmatpush3.bf16.msra.mxu1 %v688_v11  ;;  %602 = vmatprep.subr.bf16.mxu0 %v689_v12  ;;  %v61_v32 = vld [vmem:[#allocation2] sm:$0xff]  ;;  %v62_v33 = vld [vmem:[#allocation2 + $0x8] sm:$0xff]  ;;  %v718_v44 = vld [vmem:[#allocation7 + $0x28] sm:$0xff]  }
  0x43   :  { %624 = vmatprep.subr.bf16.mxu1 %v690_v13  ;;  %v551_v34 = vcombine.low %v61_v32, %v61_v32  ;;  %v552_v35 = vcombine.high %v61_v32, %v61_v32  ;;  %v553_v36 = vcombine.low %v62_v33, %v62_v33  ;;  %v554_v37 = vcombine.high %v62_v33, %v62_v33  ;;  %v715_v41 = vld [vmem:[#allocation7 + $0x10] sm:$0xff]   ;;  %v716_v42 = vld [vmem:[#allocation7 + $0x18] sm:$0xff]  }
  0x44   :  { %v719_v45 = vld [vmem:[#allocation7 + $0x30] sm:$0xff]   ;;  %v720_v46 = vld [vmem:[#allocation7 + $0x38] sm:$0xff]  }
  0x45   :  { %603 = vmatpush3.bf16.msra.mxu0 %v691_v14  ;;  %372 = vmatprep.mubr.bf16.mxu0 %v552_v35  ;;  %v550_v49 = vld [vmem:[%s915_s2] ss:$0 sm:$0xff]  ;;  %s787_s2 = scalar_lea.vmem %s541_s8, 128 }
  0x46   :  { %625 = vmatpush3.bf16.msra.mxu1 %v692_v15  ;;  %604 = vmatprep.subr.bf16.mxu0 %v693_v16  ;;  %v587_v62 = vld [vmem:[%s917_s4] ss:$0 sm:$0xff]  ;;  %p788_p10 = scmp.ne.s32.totalorder %s541_s8, %s787_s2  ;;  %p793_p12 = scmp.lt.s32.totalorder %s787_s2, %s787_s2 }
  0x47   :  { %626 = vmatprep.subr.bf16.mxu1 %v694_v17  ;;  %412 = vmatprep.mubr.bf16.mxu1 %v554_v37 }
  0x48   :  { %p794_p13 = por %p793_p12, %p792_p11 }
  0x49   :  { %605 = vmatpush3.bf16.msra.mxu0 %v695_v18 }
  0x4a   :  { %627 = vmatpush3.bf16.msra.mxu1 %v696_v19  ;;  %606 = vmatprep.subr.bf16.mxu0 %v697_v20  ;;  %p795_p0 = pnand %p794_p13, %p788_p10 }
  0x4b   :  { %628 = vmatprep.subr.bf16.mxu1 %v698_v21 }
  0x4d   :  { %607 = vmatpush3.bf16.msra.mxu0 %v699_v22 }
  0x4e   :  { %629 = vmatpush3.bf16.msra.mxu1 %v700_v23  ;;  %608 = vmatprep.subr.bf16.mxu0 %v701_v24 }
  0x4f   :  { %630 = vmatprep.subr.bf16.mxu1 %v702_v25 }
  0x51   :  { %609 = vmatpush3.bf16.msra.mxu0 %v703_v26 }
  0x52   :  { %631 = vmatpush3.bf16.msra.mxu1 %v704_v27  ;;  %610 = vmatprep.subr.bf16.mxu0 %v705_v28 }
  0x53   :  { %632 = vmatprep.subr.bf16.mxu1 %v706_v29 }
  0x55   :  { %611 = vmatpush3.bf16.msra.mxu0 %v707_v30 }
  0x56   :  { %633 = vmatpush3.bf16.msra.mxu1 %v708_v31  ;;  %649 = vmatprep.subr.bf16.mxu0 %v820_v39 }
  0x58   :  { %373 = vmatmul.mubr.bf16.vlgmr.msra.gmra.mrb[0].mxu0 %v551_v34 }
  0x59   :  { %413 = vmatmul.mubr.bf16.vlgmr.msra.gmra.mrb[0].mxu1 %v553_v36  ;;  %650 = vmatpush3.bf16.msra.mxu0 %v713_v38 }
  0x5a   :  { %651 = vmatprep.subr.bf16.mxu0 %v820_v39  ;;  %665 = vmatprep.mubr.msk.bf16.mxu0 %vm821_vm0, %v820_v39 }
  0x5d   :  { %652 = vmatpush3.bf16.msra.mxu0 %v714_v40 }
  0x5e   :  { %653 = vmatprep.subr.bf16.mxu0 %v820_v39 }
  0x61   :  { %654 = vmatpush3.bf16.msra.mxu0 %v715_v41 }
  0x62   :  { %655 = vmatprep.subr.bf16.mxu0 %v820_v39 }
  0x65   :  { %656 = vmatpush3.bf16.msra.mxu0 %v716_v42 }
  0x66   :  { %657 = vmatprep.subr.bf16.mxu0 %v820_v39 }
  0x69   :  { %658 = vmatpush3.bf16.msra.mxu0 %v717_v43 }
  0x6a   :  { %659 = vmatprep.subr.bf16.mxu0 %v820_v39 }
  0x6d   :  { %660 = vmatpush3.bf16.msra.mxu0 %v718_v44 }
  0x6e   :  { %661 = vmatprep.subr.bf16.mxu0 %v820_v39 }
  0x71   :  { %662 = vmatpush3.bf16.msra.mxu0 %v719_v45 }
  0x72   :  { %663 = vmatprep.subr.bf16.mxu0 %v820_v39 }
  0x75   :  { %664 = vmatpush3.bf16.msra.mxu0 %v720_v46 }
 0x12b   :  { %v612_v47 = vpop.f32.mrb[0].mxu0 }
 0x12c   :  { %v634_v48 = vpop.f32.mrb[0].mxu1  ;;  %v613_v50 = vpop.f32.mrb[1].mxu0 }
 0x12d   :  { %v635_v51 = vpop.f32.mrb[1].mxu1  ;;  %v614_v52 = vadd.f32 %v613_v50, %v612_v47  ;;  %v615_v54 = vpop.f32.mrb[2].mxu0 }
 0x12e   :  { %v636_v53 = vadd.f32 %v635_v51, %v634_v48  ;;  %v637_v55 = vpop.f32.mrb[2].mxu1  ;;  %v616_v56 = vpop.f32.mrb[3].mxu0 }
 0x12f   :  { %v638_v57 = vpop.f32.mrb[3].mxu1  ;;  %v375_v58 = vadd.f32 %v614_v52, %v550_v49 }
 0x131   :  { %v415_v59 = vadd.f32 %v636_v53, %v375_v58 }
 0x133   :  { %v420_v60 = vmax.f32 %v415_v59, 0.0 }
 0x135   :  { %v421_v61 = vpack.c.bf16 %v420_v60, %v420_v60 }
 0x137   :  { %666 = vmatmul.mubr.bf16.vlgmr.msra.gmra.mrb[4].mxu0 %v421_v61 }
 0x20a   :  { %v527_v63 = vpop.f32.mrb[4].mxu0 }
 0x20b   :  { %v528_v0 = vadd.f32 %v587_v62, %v527_v63  ;;  %v667_v1 = vpop.f32.mrb[5].mxu0 }
 0x20c   :  { %v530_v2 = vpop.f32.mrb[6].mxu0 }
 0x20d   :  { %533 = vst [vmem:[#allocation8] sm:$0xff] %v528_v0  ;;  %v668_v3 = vpop.f32.mrb[7].mxu0 }
 0x20e   :  { %798 = shalt.err (!%p795_p0)
}
 0x20f   :  { %s799_s4 = scalar_lea.hbm %s918_s5, 128 }
 0x210   :  { %p800_p1 = scmp.ne.s32.totalorder %s918_s5, %s799_s4  ;;  %p803_p2 = scmp.lt.u32.totalorder %s799_s4, %s918_s5 }
 0x212   :  { %p805_p3 = pnand %p803_p2, %p800_p1 }
 0x214   :  { %808 = shalt.err (!%p805_p3)
}
 0x215   :  { %543 = dma.vmem_to_hbm [thread:$0]  %s541_s8, 128, %s918_s5, [#allocation4]  }
 0x216   :  { %813 = dma.done.wait [#allocation4], 128  }
 0x217   :  { %814 = vsyncadd [#allocation4], 4294967168 }
 0x218   :  { %547 = vsyncpa [#allocation3], 1 }
 0x219   :  { %548 = vsyncpa [#allocation6], 1 }
 0x21a   :  { %549 = vsyncpa [#allocation4], 1 }

</bundles_post_ra>
